<compile_context>
chip_gen: v5e
topology: v5e:2x2
jax: 0.10.0
libtpu: 0.0.40
codegen_flags: <defaults>
</compile_context>

<pallas_src>
import math

import jax
import jax.numpy as jnp
from jax.experimental import pallas as pl
from jax.experimental.pallas import tpu as pltpu


def _spatial_dropout_kernel(x_ref, noise_ref, o_ref):
    # x_ref / o_ref: (1, tT, tE); noise_ref: (1, 1, tE) f32, broadcast over tT.
    # Multiply promotes to f32 (exact 1/keep_prob scale), single round on store.
    o_ref[...] = (x_ref[...] * noise_ref[...]).astype(o_ref.dtype)


def _vmem_budget():
    """(per-block byte budget, vmem_limit_bytes), generation-aware."""
    phys = 64 << 20  # conservative fallback = smallest per-TC VMEM (v7x)
    try:
        info = pltpu.get_tpu_info()
        cap = getattr(info, "vmem_capacity_bytes", None)
        if cap:
            phys = int(cap)
    except Exception:
        pass
    # 2 input + 2 output big buffers (plus tiny noise buffers) must fit with
    # headroom; keep the scoped limit under ~half of physical VMEM.
    limit = min(phys // 2, 48 << 20)
    block = (limit // 5) // (1 << 20) * (1 << 20)  # 4 big buffers + slack
    block = max(1 << 20, min(block, 8 << 20))
    return block, limit


def _largest_lane_tile(e_p, max_elems):
    """Largest multiple of 128 that divides e_p and is <= max_elems."""
    n = e_p // 128
    best = 1
    for m in range(1, n + 1):
        if n % m == 0 and m * 128 <= max_elems:
            best = m
    return best * 128


def _pick_t_tile(t_p, t_max, sub):
    """Sublane-aligned T tile <= t_max, preferring one that divides t_p."""
    if t_p <= sub:
        return t_p  # equals the full dim -> always a legal block shape
    t_max = min(t_max, t_p)
    t_max = max(sub, t_max // sub * sub)
    d = t_max
    while d >= max(sub, t_max // 2):
        if t_p % d == 0:
            return d  # evenly divides: no ragged, masked trailing block
        d -= sub
    return t_max


def _dropout_mul(xp, noisep, *, donate=False):
    """out = xp * noisep via Pallas; xp: (B, t_p, e_p) with e_p % 128 == 0 (or tiny),
    noisep: (B, 1, e_p) f32."""
    B, t_p, e_p = xp.shape
    itemsize = xp.dtype.itemsize
    budget, vmem_limit = _vmem_budget()
    sub = max(8, 32 // itemsize)  # sublane multiple: f32 -> 8, bf16 -> 16, int8 -> 32

    # Lane tiling only kicks in for extremely wide embeddings.
    if sub * e_p * itemsize <= budget or e_p % 128 != 0:
        e_tile = e_p
    else:
        e_tile = _largest_lane_tile(e_p, budget // (sub * itemsize))

    t_max = max(sub, budget // (e_tile * itemsize))
    t_tile = _pick_t_tile(t_p, t_max, sub)

    grid = (B, pl.cdiv(t_p, t_tile), pl.cdiv(e_p, e_tile))
    extra = {"input_output_aliases": {0: 0}} if donate else {}

    return pl.pallas_call(
        _spatial_dropout_kernel,
        out_shape=jax.ShapeDtypeStruct((B, t_p, e_p), xp.dtype),
        grid=grid,
        in_specs=[
            pl.BlockSpec((1, t_tile, e_tile), lambda b, t, e: (b, t, e)),
            pl.BlockSpec((1, 1, e_tile), lambda b, t, e: (b, 0, e)),
        ],
        out_specs=pl.BlockSpec((1, t_tile, e_tile), lambda b, t, e: (b, t, e)),
        compiler_params=pltpu.CompilerParams(
            dimension_semantics=("parallel", "parallel", "parallel"),
            vmem_limit_bytes=int(vmem_limit),
        ),
        **extra,
    )(xp, noisep)


def spatial_dropout(x, *, drop=0.5, seed=0, key=None, training=True, donate=False):
    """SpatialDropout_2.forward with the default noise_shape (B, 1, ..., 1, E)."""
    # TODO(synk): custom `noise_shape` arguments are not supported; only the
    # default (B, 1, ..., 1, E) channel-dropout pattern is implemented.
    if not training or drop == 0.0:
        return x
    if drop >= 1.0:
        return jnp.zeros_like(x)

    orig_shape = x.shape
    B, E = orig_shape[0], orig_shape[-1]
    T = math.prod(orig_shape[1:-1]) if len(orig_shape) > 2 else 1
    x3 = x.reshape(B, T, E)

    keep_prob = 1.0 - float(drop)
    if key is None:
        key = jax.random.PRNGKey(seed)
    keep = jax.random.bernoulli(key, p=keep_prob, shape=(B, 1, E))
    # Keep the mask/scale in f32 so 1/keep_prob is exact (single rounding in-kernel).
    noise = keep.astype(jnp.float32) * jnp.float32(1.0 / keep_prob)

    # Lane-dense repack: fold r consecutive timesteps into the lane axis so the
    # kernel's last dim is a multiple of 128; replicate the per-channel mask r
    # times (lane (t % r) * E + e maps back to channel e, so spatial-dropout
    # semantics are preserved).
    r = 128 // math.gcd(E, 128)
    if r == 1:
        out3 = _dropout_mul(x3, noise, donate=donate).reshape(B, T, E)
    else:
        t_main = (T // r) * r
        parts = []
        if t_main > 0:
            xm = x3[:, :t_main, :].reshape(B, t_main // r, E * r)
            nm = jnp.tile(noise, (1, 1, r))
            om = _dropout_mul(xm, nm, donate=donate).reshape(B, t_main, E)
            parts.append(om)
        if t_main < T:
            # Tiny tail (< r timesteps): plain XLA multiply instead of forcing
            # a lane-sparse (masked-store) kernel over the whole tensor.
            xt = x3[:, t_main:, :]
            parts.append((xt.astype(jnp.float32) * noise).astype(x.dtype))
        out3 = parts[0] if len(parts) == 1 else jnp.concatenate(parts, axis=1)

    return out3.reshape(orig_shape)


def _reference(x, drop, seed):
    """Pure-JAX reference with the exact same mask as spatial_dropout(seed=...)."""
    B, E = x.shape[0], x.shape[-1]
    keep_prob = 1.0 - drop
    keep = jax.random.bernoulli(jax.random.PRNGKey(seed), p=keep_prob, shape=(B, 1, E))
    noise = keep.astype(jnp.float32) * jnp.float32(1.0 / keep_prob)
    T = math.prod(x.shape[1:-1]) if x.ndim > 2 else 1
    y = (x.reshape(B, T, E).astype(jnp.float32) * noise).astype(x.dtype)
    return y.reshape(x.shape)


if __name__ == "__main__":
    drop = 0.5
    keep_prob = 1.0 - drop

    # Lane-folded path: E = 32 -> r = 4, T divisible by r.
    B, T, E = 2, 8, 32
    x = jax.random.normal(jax.random.PRNGKey(0), (B, T, E), dtype=jnp.float32)
    out = jax.block_until_ready(spatial_dropout(x, drop=drop, seed=1234, training=True))
    ref = _reference(x, drop, 1234)
    assert out.shape == x.shape and out.dtype == x.dtype
    assert bool(jnp.allclose(out, ref, rtol=1e-6, atol=1e-6)), "mismatch vs reference"
    # Every element is 0 or x / keep_prob (spatial dropout scaling).
    is_zero = jnp.isclose(out, 0.0, atol=1e-6)
    is_scaled = jnp.isclose(out, x / keep_prob, rtol=1e-5, atol=1e-6)
    assert bool(jnp.all(is_zero | is_scaled))

    # Ragged path: T % r != 0 (main chunk via kernel, tiny tail via XLA mul).
    x2 = jax.random.normal(jax.random.PRNGKey(1), (2, 10, 32), dtype=jnp.float32)
    out2 = jax.block_until_ready(spatial_dropout(x2, drop=drop, seed=7, training=True))
    assert bool(jnp.allclose(out2, _reference(x2, drop, 7), rtol=1e-6, atol=1e-6))

    # bf16 path (f32 mask, single rounding on store).
    xb = jax.random.normal(jax.random.PRNGKey(2), (2, 16, 32), dtype=jnp.bfloat16)
    outb = jax.block_until_ready(spatial_dropout(xb, drop=drop, seed=3, training=True))
    assert bool(jnp.allclose(outb.astype(jnp.float32),
                             _reference(xb, drop, 3).astype(jnp.float32),
                             rtol=1e-2, atol=1e-2))

    # Eval / drop == 0 are identity; drop == 1 is zeros (module semantics).
    assert bool(jnp.all(spatial_dropout(x, drop=drop, training=False) == x))
    assert bool(jnp.all(spatial_dropout(x, drop=0.0, training=True) == x))
    assert bool(jnp.all(spatial_dropout(x, drop=1.0, training=True) == 0))

    print("KERNEL_OK")
</pallas_src>

<mosaic_0001>
module attributes {stable_mosaic.version = 11 : i64} {
  func.func @_spatial_dropout_kernel(%arg0: i32, %arg1: i32, %arg2: i32, %arg3: memref<1x2x128xf32, #tpu.memory_space<vmem>>, %arg4: memref<1x1x128xf32, #tpu.memory_space<vmem>>, %arg5: memref<1x2x128xf32, #tpu.memory_space<vmem>>) attributes {dimension_semantics = [#tpu.dimension_semantics<parallel>, #tpu.dimension_semantics<parallel>, #tpu.dimension_semantics<parallel>], iteration_bounds = array<i64: 2, 1, 1>, scalar_prefetch = 0 : i64, scratch_operands = 0 : i64, tpu.core_type = #tpu.core_type<tc>, window_params = [{transform_indices = @transform_0, window_bounds = array<i64: 1, 2, 128>}, {transform_indices = @transform_1, window_bounds = array<i64: 1, 1, 128>}, {transform_indices = @transform_2, window_bounds = array<i64: 1, 2, 128>}]} {
    %c0 = arith.constant 0 : index
    %c0_0 = arith.constant 0 : index
    %c0_1 = arith.constant 0 : index
    %0 = vector.load %arg3[%c0, %c0_0, %c0_1] : memref<1x2x128xf32, #tpu.memory_space<vmem>>, vector<1x2x128xf32>
    %c0_2 = arith.constant 0 : index
    %c0_3 = arith.constant 0 : index
    %c0_4 = arith.constant 0 : index
    %1 = vector.load %arg4[%c0_2, %c0_3, %c0_4] : memref<1x1x128xf32, #tpu.memory_space<vmem>>, vector<1x1x128xf32>
    %2 = vector.broadcast %1 : vector<1x1x128xf32> to vector<1x2x128xf32>
    %3 = arith.mulf %0, %2 : vector<1x2x128xf32>
    %c0_5 = arith.constant 0 : index
    %c0_6 = arith.constant 0 : index
    %c0_7 = arith.constant 0 : index
    %4 = vector.load %arg5[%c0_5, %c0_6, %c0_7] : memref<1x2x128xf32, #tpu.memory_space<vmem>>, vector<1x2x128xf32>
    tpu.vector_store %arg5[%c0_5, %c0_6, %c0_7], %3 {strides = array<i32>} : memref<1x2x128xf32, #tpu.memory_space<vmem>>, vector<1x2x128xf32>,
    return
  }
  func.func @transform_0(%arg0: i32, %arg1: i32, %arg2: i32) -> (i32, i32, i32) {
    %c0_i32 = arith.constant 0 : i32
    return %arg0, %arg1, %arg2 : i32, i32, i32
  }
  func.func @transform_1(%arg0: i32, %arg1: i32, %arg2: i32) -> (i32, i32, i32) {
    %c0_i32 = arith.constant 0 : i32
    %c0_i32_0 = arith.constant 0 : i32
    return %arg0, %c0_i32, %arg2 : i32, i32, i32
  }
  func.func @transform_2(%arg0: i32, %arg1: i32, %arg2: i32) -> (i32, i32, i32) {
    %c0_i32 = arith.constant 0 : i32
    return %arg0, %arg1, %arg2 : i32, i32, i32
  }
}

</mosaic_0001>

<bundles_post_ra>
// kernel: tpu_custom_call.1
= control target key start
LH: loop header
LB: loop body
LE: loop exit
PB: predicated region body
PF: predicated region fallthrough
CT: control target
= control target key end

     0   :  { %7 = vsyncpa [#allocation3], 0  ;;  %s732_s0 = inlined_call_operand.hbm [shape: f32[2,2,128], index: 0, kind: input, shape index: {}]   ;;  %s733_s1 = inlined_call_operand.hbm [shape: f32[2,1,128], index: 1, kind: input, shape index: {}]   ;;  %s734_s2 = inlined_call_operand.hbm [shape: f32[2,2,128], index: 2, kind: output, shape index: {}]  }
   0x1   :  { %9 = vsyncpa [#allocation3 + $0x1], 0 }
   0x2   :  { %10 = vsyncpa [#allocation6], 0 }
   0x3   :  { %12 = vsyncpa [#allocation6 + $0x1], 0 }
   0x4   :  { %13 = vsyncpa [#allocation4], 0 }
   0x5   :  { %15 = vsyncpa [#allocation4 + $0x1], 0  ;;  %s602_s9 = smov 0   ;;  %s604_s10 = smov 0  }
   0x6   :  { %s606_s11 = smov 0   ;;  %s608_s12 = smov 0  }
   0x7   :  { %s610_s13 = smov 0   ;;  %s612_s14 = smov 0  }
   0x8 LB: > { %s358_s15 = sadd.s32 4294967295, %s585_s14   ;;  %s359_s16 = sadd.s32 4294967294, %s585_s14   ;;  %s585_s14 = sphi %s612_s14, %s21_s14   ;;  %s581_s13 = sphi %s610_s13, %s743_s13   ;;  %s577_s12 = sphi %s608_s12, %s742_s12   ;;  %s573_s11 = sphi %s606_s11, %s741_s11   ;;  %s569_s10 = sphi %s604_s10, %s740_s10   ;;  %s565_s9 = sphi %s602_s9, %s739_s9  }
   0x9   : > { %s40_s17 = sadd.s32 1, %s581_s13  ;;  %s51_s18 = sadd.s32 1, %s573_s11 }
   0xa   : > { %p42_p0 = scmp.ge.s32.totalorder %s40_s17, 2  ;;  %p58_p1 = scmp.ne.s32.totalorder %s573_s11, %s569_s10 }
   0xb   : > { %p59_p2 = scmp.eq.s32.totalorder %s585_s14, 0  ;;  %p64_p3 = scmp.ne.s32.totalorder %s569_s10, %s565_s9 }
   0xc   : > { %s745_s17 = smov (%p42_p0, %s40_s17), 0  ;;  %p65_p5 = scmp.eq.s32.totalorder %s358_s15, 0 }
   0xd   : > { %p643_p4 = por %p59_p2, %p58_p1  ;;  %s44_s20 = ssub.s32 %s581_s13, %s745_s17 }
   0xe   : > { %p120_p6 = scmp.eq.s32.totalorder %s358_s15, 1  ;;  %p49_p7 = scmp.eq.s32.totalorder %s44_s20, 0 }
   0xf   : > { %p649_p8 = por %p65_p5, %p64_p3  ;;  %p126_p10 = scmp.eq.s32.totalorder %s359_s16, 1 }
  0x10   : > { %p653_p9 = por %p120_p6, %p58_p1  ;;  %p361_p12 = scmp.ge.s32.totalorder %s585_s14, 2 }
  0x11   : > { %s658_s23 = scalar_select %p49_p7, %s573_s11, %s51_s18  }
  0x12   : > { %p660_p11 = por %p126_p10, %p64_p3  ;;  %p388_p13 = scmp.lt.s32.totalorder %s585_s14, 2 }
  0x13   : > { %s146_s25 = sand.u32 1, %s573_s11   ;;  %s363_s27 = sshll.u32 %s581_s13, 1 }
  0x14   : > { %s362_s26 = sshll.u32 %s146_s25, 1  ;;  %s156_s30 = scalar_lea.hbm %s732_s0, %s363_s27 }
  0x15   : > { %s150_s3 = scalar_lea.vmem [#allocation2], %s362_s26  ;;  %s158_s5 = sshll.u32 %s156_s30, 4  ;;  %s159_s5 = int_to_ptr.hbm [resolvable:$true] %s158_s5 }
  0x16   : > { %s160_s4 = sshll.u32 %s150_s3, 4  ;;  %p378_p0 = pnand %p388_p13, %p643_p4  ;;  %s161_s4 = int_to_ptr.vmem [resolvable:$true] %s160_s4 }
  0x17   : > { %p364_p1 = scmp.ge.s32.totalorder %s585_s14, 1  ;;  %p183_p2 = scmp.lt.s32.totalorder %s585_s14, 3 }
  0x18   : > { %s147_s6 = scalar_lea.sflag [#allocation3], %s146_s25  ;;  %s174_s15 = scalar_lea.hbm %s733_s1, %s581_s13 }
  0x19   : > { %380 = dma.hbm_to_vmem [thread:$0]  (!%p378_p0), %s159_s5, 32, %s161_s4, %s147_s6  }
  0x1a   : > { %p184_p3 = pnand %p364_p1, %p183_p2  ;;  %s170_s16 = scalar_lea.vmem [#allocation5], %s146_s25 }
  0x1b   : > { %s178_s18 = sshll.u32 %s170_s16, 4  ;;  %s176_s20 = sshll.u32 %s174_s15, 4  ;;  %s179_s18 = int_to_ptr.vmem [resolvable:$true] %s178_s18  ;;  %s177_s20 = int_to_ptr.hbm [resolvable:$true] %s176_s20 }
  0x1c   : > { %s168_s26 = scalar_lea.sflag [#allocation6], %s146_s25  ;;  %187 = sbr.rel (%p184_p3) target bundleno = 51 (0x33), region = 28 }
  0x1d   : > { %383 = dma.hbm_to_vmem [thread:$0]  (!%p378_p0), %s177_s20, 16, %s179_s18, %s168_s26  }
  0x1e   : > { %s680_s19 = sand.u32 (!%p184_p3), 1, %s569_s10  }
  0x1f   : > { %s365_s27 = sshll.u32 (!%p184_p3), %s680_s19, 1  ;;  %s190_s28 = scalar_lea.sflag (!%p184_p3), [#allocation3], %s680_s19 }
  0x20   : > { %s193_s29 = scalar_lea.vmem (!%p184_p3), [#allocation2], %s365_s27 }
  0x21   : > { %552 = dma.done.wait (%p649_p8), %s190_s28, 32  }
  0x22   : > { %554 = vsyncadd (%p649_p8), %s190_s28, 4294967264  ;;  %s200_s25 = scalar_lea.sflag [#allocation6], %s680_s19  ;;  %s202_s30 = scalar_lea.vmem [#allocation5], %s680_s19 }
  0x23   : > { %556 = dma.done.wait (%p649_p8), %s200_s25, 16  }
  0x24   : > { %558 = vsyncadd (%p649_p8), %s200_s25, 4294967280  ;;  %s368_s3 = sshll.u32 %s577_s12, 1  ;;  %s227_s7 = scalar_lea.vmem [#allocation7], %s365_s27  ;;  %v228_v0 = vld [vmem:[%s193_s29] sm:$0x3] }
  0x25   : > { %s248_s6 = scalar_lea.hbm %s734_s2, %s368_s3  ;;  %s250_s8 = sshll.u32 %s227_s7, 4  ;;  %v438_v1 = vld [vmem:[%s202_s30] ss:$0 sm:$0xff]  ;;  %s251_s8 = int_to_ptr.vmem [resolvable:$true] %s250_s8 }
  0x26   : > { %s252_s15 = sshll.u32 %s248_s6, 4  ;;  %v233_v2 = vmul.f32 %v438_v1, %v228_v0  ;;  %s236_s16 = scalar_lea.sflag [#allocation4], %s680_s19  ;;  %s253_s15 = int_to_ptr.hbm [resolvable:$true] %s252_s15 }
  0x27   : > { %s513_s21 = sshra.s32 %s253_s15, 4  ;;  %s519_s26 = scalar_lea.hbm %s734_s2, 4  ;;  %s514_s21 = int_to_ptr.hbm [resolvable:$true] %s513_s21 }
  0x28   : > { %234 = vst [vmem:[%s227_s7] sm:$0x3] %v233_v2  ;;  %s515_s18 = scalar_lea.hbm %s514_s21, 2  ;;  %p520_p7 = scmp.lt.s32.totalorder %s514_s21, %s734_s2 }
  0x29   : > { %p516_p4 = scmp.ne.s32.totalorder %s514_s21, %s515_s18  ;;  %p521_p8 = scmp.lt.s32.totalorder %s519_s26, %s515_s18 }
  0x2b   : > { %p517_p5 = pnand %p516_p4, %p653_p9  ;;  %p522_p10 = por %p521_p8, %p520_p7 }
  0x2d   : > { %p518_p6 = pneg %p517_p5 }
  0x2f   : > { %p523_p13 = pnand %p522_p10, %p518_p6 }
  0x31   : > { %526 = shalt.err (!%p523_p13)
}
  0x32   : > { %375 = dma.vmem_to_hbm [thread:$0]  (%p653_p9), %s251_s8, 32, %s253_s15, %s236_s16  }
  0x33 PF: > { %s264_s19 = sand.u32 1, %s565_s9   ;;  %p385_p0 = pnand %p361_p12, %p660_p11 }
  0x34   : > { %s265_s29 = scalar_lea.sflag [#allocation4], %s264_s19 }
  0x35   : > { %p386_p1 = pneg %p385_p0 }
  0x37   : > { %560 = dma.done.wait (%p386_p1), %s265_s29, 32  }
  0x38   : > { %562 = vsyncadd (%p386_p1), %s265_s29, 4294967264  ;;  %s21_s14 = sadd.s32 1, %s585_s14   ;;  %s739_s9 = smov %s569_s10 }
  0x39   : > { %p18_p2 = scmp.ge.s32.totalorder %s21_s14, 4   ;;  %s740_s10 = smov %s573_s11 }
  0x3a   : > { %s741_s11 = smov %s658_s23  ;;  %s742_s12 = smov %s581_s13 }
  0x3b   : > { %s743_s13 = smov %s745_s17  ;;  %20 = sbr.rel (!%p18_p2) target bundleno = 8 (0x8), region = 86 }
  0x40   :  { %271 = vsyncpa [#allocation3], 1 }
  0x41   :  { %273 = vsyncpa [#allocation3 + $0x1], 1 }
  0x42   :  { %274 = vsyncpa [#allocation6], 1 }
  0x43   :  { %276 = vsyncpa [#allocation6 + $0x1], 1 }
  0x44   :  { %277 = vsyncpa [#allocation4], 1 }
  0x45   :  { %279 = vsyncpa [#allocation4 + $0x1], 1 }

</bundles_post_ra>
